<compile_context>
chip_gen: v7x
topology: tpu7x:2x2x1
jax: 0.10.0
libtpu: 0.0.40
codegen_flags: <defaults>
</compile_context>

<pallas_src>
import jax
import jax.numpy as jnp
from jax.experimental import pallas as pl
from jax.experimental.pallas import tpu as pltpu


def _round_up(x, m):
    return ((x + m - 1) // m) * m


def _cdiv(a, b):
    return -(-a // b)


def _make_se_kernel(inv_hw):
    inv_hw = float(inv_hw)

    def _se_kernel(x_ref, w1t_ref, s1_ref, b1_ref, w2t_ref, s2_ref, b2_ref,
                   o_ref):
        # x_ref/o_ref: (TB, C, HW_pad)
        # w1t_ref: (C, Cmid) f32   s1/b1: (1, Cmid) f32
        # w2t_ref: (Cmid, C) f32   s2/b2: (1, C)    f32

        # Squeeze: spatial sum (f32 accumulate) * 1/HW.  Padding lanes are
        # zero so the sum is exact; dividing by the true HW gives the mean.
        pooled = jnp.sum(x_ref[...], axis=2, dtype=jnp.float32) * inv_hw  # (TB, C)

        # Excite: two small GEMMs on pre-cast f32 weights, BN folded.
        y1 = jnp.dot(pooled, w1t_ref[...],
                     preferred_element_type=jnp.float32)                  # (TB, Cmid)
        y1 = jnp.maximum(y1 * s1_ref[...] + b1_ref[...], 0.0)             # BN + ReLU
        y2 = jnp.dot(y1, w2t_ref[...],
                     preferred_element_type=jnp.float32)                  # (TB, C)
        y2 = y2 * s2_ref[...] + b2_ref[...]                               # BN
        gate = jnp.clip(y2 + 3.0, 0.0, 6.0) * (1.0 / 6.0)                 # hsigmoid

        # Scale: re-read the slab from VMEM and multiply in the native dtype.
        o_ref[...] = x_ref[...] * gate[:, :, None].astype(o_ref.dtype)

    return _se_kernel


def _vmem_budget():
    """Returns (vmem_limit_cap_bytes, slab_target_bytes) for this chip."""
    try:
        cap = int(pltpu.get_tpu_info().vmem_capacity_bytes)
    except Exception:  # pragma: no cover - conservative fallback
        cap = 64 << 20
    if cap <= (64 << 20):
        # v7x-class: 64 MiB physical.  ~6 MiB slabs keep 4x double-buffered
        # in+out well under a 56 MiB scoped budget.
        return cap - (8 << 20), 6 << 20
    # v5e / v6e-class: 128 MiB physical.  Larger slabs amortize the ~0.35 us
    # per-step overhead; scoped limit lifted well past the 16 MiB default.
    return min(cap - (32 << 20), 96 << 20), 12 << 20


def _pick_tiling(B, per_image_bytes, target_bytes, min_slab_bytes=1 << 20):
    """Pick (TB, n_steps) so each grid step streams ~target_bytes.

    Ragged B is handled by the caller padding the batch to TB * n_steps.
    Prefers an even step count (v7x megacore) only when the per-step slab
    stays >= min_slab_bytes.
    """
    per_image_bytes = max(1, per_image_bytes)
    tb = max(1, min(B, target_bytes // per_image_bytes))
    n_steps = _cdiv(B, tb)
    if B > 1 and n_steps % 2 == 1:
        tb_try = _cdiv(B, n_steps + 1)
        if tb_try * per_image_bytes >= min_slab_bytes:
            tb = tb_try
            n_steps = _cdiv(B, tb)
    return tb, n_steps


def se_module(x, w1, s1, b1, w2, s2, b2):
    """x: (B, C, H, W).  w1: (Cmid, C), w2: (C, Cmid), s*/b*: folded BN.
    Returns (B, C, H, W)."""
    B, C, H, W = x.shape
    Cmid = w1.shape[0]
    HW = H * W
    HW_pad = _round_up(HW, 128)
    itemsize = jnp.dtype(x.dtype).itemsize

    vmem_cap, target_bytes = _vmem_budget()
    per_image = C * HW_pad * itemsize
    TB, n_steps = _pick_tiling(B, per_image, target_bytes)
    B_pad = TB * n_steps

    x_flat = x.reshape(B, C, HW)
    if B_pad != B or HW_pad != HW:
        x_flat = jnp.pad(x_flat, ((0, B_pad - B), (0, 0), (0, HW_pad - HW)))

    # Pre-transpose AND pre-cast the 1x1-conv weights / folded BN params so
    # the kernel does no per-step dtype conversion.
    w1t = w1.T.astype(jnp.float32)                 # (C, Cmid)
    w2t = w2.T.astype(jnp.float32)                 # (Cmid, C)
    s1r = s1.reshape(1, Cmid).astype(jnp.float32)
    b1r = b1.reshape(1, Cmid).astype(jnp.float32)
    s2r = s2.reshape(1, C).astype(jnp.float32)
    b2r = b2.reshape(1, C).astype(jnp.float32)

    # Scoped VMEM: double-buffered in + out slabs plus small weights, capped
    # by physical VMEM (minus headroom) for this generation.
    slab_bytes = TB * C * HW_pad * itemsize
    weight_bytes = (2 * C * Cmid + 2 * (C + Cmid)) * 4
    vmem_limit = int(min(vmem_cap,
                         max(16 << 20, 4 * slab_bytes + weight_bytes + (4 << 20))))

    full2 = lambda i: (0, 0)
    out = pl.pallas_call(
        _make_se_kernel(1.0 / HW),
        out_shape=jax.ShapeDtypeStruct((B_pad, C, HW_pad), x.dtype),
        grid_spec=pltpu.PrefetchScalarGridSpec(
            num_scalar_prefetch=0,
            grid=(n_steps,),
            in_specs=[
                pl.BlockSpec((TB, C, HW_pad), lambda i: (i, 0, 0)),  # x tile
                pl.BlockSpec((C, Cmid), full2),                      # w1^T
                pl.BlockSpec((1, Cmid), full2),                      # bn1 scale
                pl.BlockSpec((1, Cmid), full2),                      # bn1 shift
                pl.BlockSpec((Cmid, C), full2),                      # w2^T
                pl.BlockSpec((1, C), full2),                         # bn2 scale
                pl.BlockSpec((1, C), full2),                         # bn2 shift
            ],
            out_specs=pl.BlockSpec((TB, C, HW_pad), lambda i: (i, 0, 0)),
        ),
        compiler_params=pltpu.CompilerParams(
            dimension_semantics=("parallel",),
            vmem_limit_bytes=vmem_limit),
    )(x_flat, w1t, s1r, b1r, w2t, s2r, b2r)

    if B_pad != B or HW_pad != HW:
        out = out[:B, :, :HW]
    return out.reshape(B, C, H, W)


def _reference(x, w1, s1, b1, w2, s2, b2):
    pooled = jnp.mean(x, axis=(2, 3))                       # (B, C)
    y1 = pooled @ w1.T                                      # (B, Cmid)
    y1 = jnp.maximum(y1 * s1[None, :] + b1[None, :], 0.0)
    y2 = y1 @ w2.T                                          # (B, C)
    y2 = y2 * s2[None, :] + b2[None, :]
    gate = jnp.clip(y2 + 3.0, 0.0, 6.0) / 6.0
    return x * gate[:, :, None, None]


if __name__ == "__main__":
    B, C, H, W = 2, 8, 16, 16
    reduction = 4
    Cmid = C // reduction
    eps = 1e-5

    key = jax.random.PRNGKey(0)
    k = jax.random.split(key, 9)

    x = jax.random.normal(k[0], (B, C, H, W), dtype=jnp.float32)

    # Conv weights (1x1, no bias) -> stored as (out, in) matrices.
    w1 = jax.random.normal(k[1], (Cmid, C), dtype=jnp.float32) * 0.5
    w2 = jax.random.normal(k[2], (C, Cmid), dtype=jnp.float32) * 0.5

    # BatchNorm params (inference mode), folded into scale/shift.
    g1 = jax.random.uniform(k[3], (Cmid,), minval=0.5, maxval=1.5)
    be1 = jax.random.normal(k[4], (Cmid,)) * 0.1
    rm1 = jax.random.normal(k[5], (Cmid,)) * 0.1
    rv1 = jax.random.uniform(k[6], (Cmid,), minval=0.5, maxval=1.5)
    g2 = jax.random.uniform(k[7], (C,), minval=0.5, maxval=1.5)
    be2 = jax.random.normal(k[8], (C,)) * 0.1
    rm2 = jnp.zeros((C,), jnp.float32)
    rv2 = jnp.ones((C,), jnp.float32)

    s1 = g1 / jnp.sqrt(rv1 + eps)
    b1 = be1 - rm1 * s1
    s2 = g2 / jnp.sqrt(rv2 + eps)
    b2 = be2 - rm2 * s2

    out = se_module(x, w1, s1, b1, w2, s2, b2)
    out = jax.block_until_ready(out)

    ref = _reference(x, w1, s1, b1, w2, s2, b2)
    assert out.shape == (B, C, H, W)
    assert jnp.allclose(out, ref, atol=1e-5, rtol=1e-5), "mismatch vs reference"

    print("KERNEL_OK")
</pallas_src>

<mosaic_0001>
module attributes {stable_mosaic.version = 11 : i64} {
  func.func @_se_kernel(%arg0: i32, %arg1: memref<2x8x256xf32, #tpu.memory_space<vmem>>, %arg2: memref<8x2xf32, #tpu.memory_space<vmem>>, %arg3: memref<1x2xf32, #tpu.memory_space<vmem>>, %arg4: memref<1x2xf32, #tpu.memory_space<vmem>>, %arg5: memref<2x8xf32, #tpu.memory_space<vmem>>, %arg6: memref<1x8xf32, #tpu.memory_space<vmem>>, %arg7: memref<1x8xf32, #tpu.memory_space<vmem>>, %arg8: memref<2x8x256xf32, #tpu.memory_space<vmem>>) attributes {dimension_semantics = [#tpu.dimension_semantics<parallel>], iteration_bounds = array<i64: 1>, scalar_prefetch = 0 : i64, scratch_operands = 0 : i64, tpu.core_type = #tpu.core_type<tc>, window_params = [{transform_indices = @transform_0, window_bounds = array<i64: 2, 8, 256>}, {pipeline_mode = #tpu.pipeline_mode<synchronous>, transform_indices = @transform_1, window_bounds = array<i64: 8, 2>}, {pipeline_mode = #tpu.pipeline_mode<synchronous>, transform_indices = @transform_2, window_bounds = array<i64: 1, 2>}, {pipeline_mode = #tpu.pipeline_mode<synchronous>, transform_indices = @transform_3, window_bounds = array<i64: 1, 2>}, {pipeline_mode = #tpu.pipeline_mode<synchronous>, transform_indices = @transform_4, window_bounds = array<i64: 2, 8>}, {pipeline_mode = #tpu.pipeline_mode<synchronous>, transform_indices = @transform_5, window_bounds = array<i64: 1, 8>}, {pipeline_mode = #tpu.pipeline_mode<synchronous>, transform_indices = @transform_6, window_bounds = array<i64: 1, 8>}, {transform_indices = @transform_7, window_bounds = array<i64: 2, 8, 256>}]} {
    %c0 = arith.constant 0 : index
    %c0_0 = arith.constant 0 : index
    %c0_1 = arith.constant 0 : index
    %0 = vector.load %arg1[%c0, %c0_0, %c0_1] : memref<2x8x256xf32, #tpu.memory_space<vmem>>, vector<2x8x256xf32>
    %cst = arith.constant dense<0.000000e+00> : vector<2x8xf32>
    %1 = vector.multi_reduction <add>, %0, %cst [2] : vector<2x8x256xf32> to vector<2x8xf32>
    %cst_2 = arith.constant 3.906250e-03 : f32
    %2 = vector.broadcast %cst_2 : f32 to vector<2x8xf32>
    %3 = arith.mulf %1, %2 : vector<2x8xf32>
    %c0_3 = arith.constant 0 : index
    %c0_4 = arith.constant 0 : index
    %4 = vector.load %arg2[%c0_3, %c0_4] : memref<8x2xf32, #tpu.memory_space<vmem>>, vector<8x2xf32>
    %cst_5 = arith.constant dense<0.000000e+00> : vector<2x2xf32>
    %5 = tpu.matmul %3, %4, %cst_5 {dimension_numbers = #tpu.dot_dimension_numbers<[1], [0], [0], [1], [0, 0, 1, 1], [], []>} : vector<2x8xf32>, vector<8x2xf32>, vector<2x2xf32> -> vector<2x2xf32>
    %c0_6 = arith.constant 0 : index
    %c0_7 = arith.constant 0 : index
    %6 = vector.load %arg3[%c0_6, %c0_7] : memref<1x2xf32, #tpu.memory_space<vmem>>, vector<1x2xf32>
    %7 = vector.broadcast %6 : vector<1x2xf32> to vector<2x2xf32>
    %8 = arith.mulf %5, %7 : vector<2x2xf32>
    %c0_8 = arith.constant 0 : index
    %c0_9 = arith.constant 0 : index
    %9 = vector.load %arg4[%c0_8, %c0_9] : memref<1x2xf32, #tpu.memory_space<vmem>>, vector<1x2xf32>
    %10 = vector.broadcast %9 : vector<1x2xf32> to vector<2x2xf32>
    %11 = arith.addf %8, %10 : vector<2x2xf32>
    %cst_10 = arith.constant 0.000000e+00 : f32
    %12 = vector.broadcast %cst_10 : f32 to vector<2x2xf32>
    %13 = arith.maximumf %11, %12 : vector<2x2xf32>
    %c0_11 = arith.constant 0 : index
    %c0_12 = arith.constant 0 : index
    %14 = vector.load %arg5[%c0_11, %c0_12] : memref<2x8xf32, #tpu.memory_space<vmem>>, vector<2x8xf32>
    %cst_13 = arith.constant dense<0.000000e+00> : vector<2x8xf32>
    %15 = tpu.matmul %13, %14, %cst_13 {dimension_numbers = #tpu.dot_dimension_numbers<[1], [0], [0], [1], [0, 0, 1, 1], [], []>} : vector<2x2xf32>, vector<2x8xf32>, vector<2x8xf32> -> vector<2x8xf32>
    %c0_14 = arith.constant 0 : index
    %c0_15 = arith.constant 0 : index
    %16 = vector.load %arg6[%c0_14, %c0_15] : memref<1x8xf32, #tpu.memory_space<vmem>>, vector<1x8xf32>
    %17 = vector.broadcast %16 : vector<1x8xf32> to vector<2x8xf32>
    %18 = arith.mulf %15, %17 : vector<2x8xf32>
    %c0_16 = arith.constant 0 : index
    %c0_17 = arith.constant 0 : index
    %19 = vector.load %arg7[%c0_16, %c0_17] : memref<1x8xf32, #tpu.memory_space<vmem>>, vector<1x8xf32>
    %20 = vector.broadcast %19 : vector<1x8xf32> to vector<2x8xf32>
    %21 = arith.addf %18, %20 : vector<2x8xf32>
    %cst_18 = arith.constant 3.000000e+00 : f32
    %22 = vector.broadcast %cst_18 : f32 to vector<2x8xf32>
    %23 = arith.addf %21, %22 : vector<2x8xf32>
    %cst_19 = arith.constant 0.000000e+00 : f32
    %cst_20 = arith.constant 6.000000e+00 : f32
    %24 = vector.broadcast %cst_19 : f32 to vector<2x8xf32>
    %25 = arith.maximumf %24, %23 : vector<2x8xf32>
    %26 = vector.broadcast %cst_20 : f32 to vector<2x8xf32>
    %27 = arith.minimumf %26, %25 : vector<2x8xf32>
    %cst_21 = arith.constant 0.166666672 : f32
    %28 = vector.broadcast %cst_21 : f32 to vector<2x8xf32>
    %29 = arith.mulf %27, %28 : vector<2x8xf32>
    %c0_22 = arith.constant 0 : index
    %c0_23 = arith.constant 0 : index
    %c0_24 = arith.constant 0 : index
    %30 = vector.load %arg1[%c0_22, %c0_23, %c0_24] : memref<2x8x256xf32, #tpu.memory_space<vmem>>, vector<2x8x256xf32>
    %31 = vector.shape_cast %29 : vector<2x8xf32> to vector<2x8x1xf32>
    %32 = vector.broadcast %31 : vector<2x8x1xf32> to vector<2x8x256xf32>
    %33 = arith.mulf %30, %32 : vector<2x8x256xf32>
    %c0_25 = arith.constant 0 : index
    %c0_26 = arith.constant 0 : index
    %c0_27 = arith.constant 0 : index
    %34 = vector.load %arg8[%c0_25, %c0_26, %c0_27] : memref<2x8x256xf32, #tpu.memory_space<vmem>>, vector<2x8x256xf32>
    tpu.vector_store %arg8[%c0_25, %c0_26, %c0_27], %33 {strides = array<i32>} : memref<2x8x256xf32, #tpu.memory_space<vmem>>, vector<2x8x256xf32>,
    return
  }
  func.func @transform_0(%arg0: i32) -> (i32, i32, i32) {
    %c0_i32 = arith.constant 0 : i32
    %c0_i32_0 = arith.constant 0 : i32
    %c0_i32_1 = arith.constant 0 : i32
    return %arg0, %c0_i32, %c0_i32_0 : i32, i32, i32
  }
  func.func @transform_1(%arg0: i32) -> (i32, i32) {
    %c0_i32 = arith.constant 0 : i32
    %c0_i32_0 = arith.constant 0 : i32
    %c0_i32_1 = arith.constant 0 : i32
    return %c0_i32, %c0_i32_0 : i32, i32
  }
  func.func @transform_2(%arg0: i32) -> (i32, i32) {
    %c0_i32 = arith.constant 0 : i32
    %c0_i32_0 = arith.constant 0 : i32
    %c0_i32_1 = arith.constant 0 : i32
    return %c0_i32, %c0_i32_0 : i32, i32
  }
  func.func @transform_3(%arg0: i32) -> (i32, i32) {
    %c0_i32 = arith.constant 0 : i32
    %c0_i32_0 = arith.constant 0 : i32
    %c0_i32_1 = arith.constant 0 : i32
    return %c0_i32, %c0_i32_0 : i32, i32
  }
  func.func @transform_4(%arg0: i32) -> (i32, i32) {
    %c0_i32 = arith.constant 0 : i32
    %c0_i32_0 = arith.constant 0 : i32
    %c0_i32_1 = arith.constant 0 : i32
    return %c0_i32, %c0_i32_0 : i32, i32
  }
  func.func @transform_5(%arg0: i32) -> (i32, i32) {
    %c0_i32 = arith.constant 0 : i32
    %c0_i32_0 = arith.constant 0 : i32
    %c0_i32_1 = arith.constant 0 : i32
    return %c0_i32, %c0_i32_0 : i32, i32
  }
  func.func @transform_6(%arg0: i32) -> (i32, i32) {
    %c0_i32 = arith.constant 0 : i32
    %c0_i32_0 = arith.constant 0 : i32
    %c0_i32_1 = arith.constant 0 : i32
    return %c0_i32, %c0_i32_0 : i32, i32
  }
  func.func @transform_7(%arg0: i32) -> (i32, i32, i32) {
    %c0_i32 = arith.constant 0 : i32
    %c0_i32_0 = arith.constant 0 : i32
    %c0_i32_1 = arith.constant 0 : i32
    return %arg0, %c0_i32, %c0_i32_0 : i32, i32, i32
  }
}

</mosaic_0001>

<bundles_post_ra>
// kernel: tpu_custom_call.1
= control target key start
LH: loop header
LB: loop body
LE: loop exit
PB: predicated region body
PF: predicated region fallthrough
CT: control target
= control target key end

     0   :  { %12 = vsyncpa [#allocation3], 0  ;;  %s473_s0 = inlined_call_operand.hbm [shape: f32[2,8,256], index: 0, kind: input, shape index: {}]   ;;  %s474_s1 = inlined_call_operand.vmem [shape: f32[8,2], index: 1, kind: input, shape index: {}]   ;;  %s475_s2 = inlined_call_operand.vmem [shape: f32[1,2], index: 2, kind: input, shape index: {}]   ;;  %s476_s3 = inlined_call_operand.vmem [shape: f32[1,2], index: 3, kind: input, shape index: {}]   ;;  %s477_s4 = inlined_call_operand.vmem [shape: f32[2,8], index: 4, kind: input, shape index: {}]   ;;  %s478_s5 = inlined_call_operand.vmem [shape: f32[1,8], index: 5, kind: input, shape index: {}]   ;;  %s479_s6 = inlined_call_operand.vmem [shape: f32[1,8], index: 6, kind: input, shape index: {}]   ;;  %s480_s7 = inlined_call_operand.hbm [shape: f32[2,8,256], index: 7, kind: output, shape index: {}]  }
   0x1   :  { %13 = vsyncpa [#allocation4], 0  ;;  %s371_s24 = smov [#allocation2]   ;;  %s323_s28 = scalar_lea.hbm %s473_s0, 512 }
   0x2   :  { %s19_s25 = sshll.u32 %s371_s24, 4  ;;  %p324_p0 = scmp.ne.s32.totalorder %s473_s0, %s323_s28  ;;  %s20_s25 = int_to_ptr.vmem [resolvable:$true] %s19_s25 }
   0x3   :  { %p327_p1 = scmp.lt.u32.totalorder %s323_s28, %s473_s0 }
   0x5   :  { %p329_p2 = pnand %p327_p1, %p324_p0 }
   0x7   :  { %332 = shalt.err (!%p329_p2)
}
   0x8   :  { %s333_s10 = scalar_lea.vmem %s20_s25, 512  ;;  %p338_p4 = scmp.lt.s32.totalorder %s20_s25, %s20_s25 }
   0x9   :  { %p334_p3 = scmp.ne.s32.totalorder %s20_s25, %s333_s10  ;;  %p339_p5 = scmp.lt.s32.totalorder %s333_s10, %s333_s10 }
   0xb   :  { %p340_p6 = por %p339_p5, %p338_p4 }
   0xd   :  { %p341_p7 = pnand %p340_p6, %p334_p3 }
   0xf   :  { %344 = shalt.err (!%p341_p7)
}
  0x10   :  { %s372_s11 = smov 256   ;;  %s373_s12 = smov 16  }
  0x11   :  { %25 = dma.hbm_to_vmem [thread:$0]  %s473_s0, 512, %s20_s25, [#allocation3], %s372_s11, %s372_s11, %s373_s12  }
  0x12   :  { %367 = dma.done.wait [#allocation3], 512  }
  0x13   :  { %368 = vsyncadd [#allocation3], 4294966784  ;;  %v41_v0 = vld [vmem:[#allocation2] sm:$0xff]  ;;  %v42_v1 = vld [vmem:[#allocation2 + $0x8] sm:$0xff]  ;;  %v374_v7 = vmov 0.0   ;;  %vm375_vm0 = vmmov 0   ;;  %v56_v8 = vlaneseq }
  0x14   :  { %v432_v2 = vld [vmem:[#allocation2 + $0x10] sm:$0xff]  ;;  %v45_v3 = vadd.f32 %v42_v1, %v41_v0  ;;  %v434_v4 = vld [vmem:[#allocation2 + $0x18] sm:$0xff]  ;;  %v53_v6 = vld [vmem:[%s474_s1] sm:$0xff]  ;;  %307 = vmatprep.subr.mxu0 %v374_v7  ;;  %309 = vmatprep.mubr.msk.f32.mxu0 %vm375_vm0, %v374_v7  ;;  %vm66_vm1 = vcmask 1041409   ;;  %vm68_vm2 = vcmask 64512   ;;  %vm163_vm3 = vcmask 1041408  }
  0x15   :  { %v48_v5 = vadd.f32 %v434_v4, %v432_v2  ;;  %308 = vmatpush3.msra.mxu0 %v53_v6  ;;  %312 = vmatprep.subr.mxu1 %v374_v7  ;;  %v57_v9 = vand.u32 127, %v56_v8  ;;  %v59_v10 = vshrl.u32 %v56_v8, 7  ;;  %v158_v19 = vld [vmem:[%s477_s4] sm:$0x3]  ;;  %vm159_vm4 = vcmask 15360  }
  0x16   :  { %46 = vadd.xlane.f32.xlu0 %v45_v3  ;;  %314 = vmatprep.mubr.msk.f32.mxu1 %vm375_vm0, %v374_v7  ;;  %v297_v20 = vld [vmem:[%s475_s2] ss:$0 sm:$0xff]  ;;  %s376_s2 = smov [#allocation5]  }
  0x17   :  { %v60_v12 = vsub.s32 %v57_v9, %v59_v10  ;;  %313 = vmatpush3.msk.msra.mxu1 %vm163_vm3, %v158_v19  ;;  %v298_v22 = vld [vmem:[%s476_s3] ss:$0 sm:$0xff]  ;;  %v259_v36 = vsub.s32 0, %v59_v10  ;;  %v266_v39 = vsub.s32 1, %v59_v10  ;;  %s284_s3 = sshll.u32 %s376_s2, 4  ;;  %s285_s3 = int_to_ptr.vmem [resolvable:$true] %s284_s3 }
  0x18   :  { %v301_v27 = vld [vmem:[%s478_s5] ss:$0 sm:$0xff]  ;;  %s345_s5 = scalar_lea.vmem %s285_s3, 512  ;;  %p350_p9 = scmp.lt.s32.totalorder %s285_s3, %s285_s3 }
  0x19   :  { %v302_v29 = vld [vmem:[%s479_s6] ss:$0 sm:$0xff]  ;;  %p346_p8 = scmp.ne.s32.totalorder %s285_s3, %s345_s5  ;;  %p351_p10 = scmp.lt.s32.totalorder %s345_s5, %s345_s5 }
  0x1a   :  { %49 = vadd.xlane.f32.xlu0 %v48_v5 }
  0x1b   :  { %p352_p11 = por %p351_p10, %p350_p9 }
  0x1d   :  { %p353_p12 = pnand %p352_p11, %p346_p8 }
  0xa3   :  { %v47_v11 = vpop.xlane.xlu0 %46 }
  0xa4   :  { %v51_v13 = vmul.f32 0.00390625, %v47_v11 }
  0xa6   :  { %v61_v16 = vrot.slane %v51_v13, %v60_v12 }
  0xa7   :  { %v50_v14 = vpop.xlane.xlu0 %49 }
  0xa8   :  { %v52_v15 = vmul.f32 0.00390625, %v50_v14 }
  0xaa   :  { %v65_v17 = vrot.slane %v52_v15, %v60_v12 }
  0xac   :  { %v67_v18 = vsel %vm66_vm1, %v65_v17, %v61_v16 }
  0xad   :  { %310 = vmatmul.mubr.msk.f32.vlgmr.msra.gmra.mrb[0].mxu0 %vm68_vm2, %v67_v18 }
 0x180   :  { %v137_v21 = vpop.f32.mrb[0].mxu0 }
 0x181   :  { %v148_v23 = vmul.f32 %v297_v20, %v137_v21  ;;  %v311_v24 = vpop.f32.mrb[1].mxu0 }
 0x183   :  { %v156_v25 = vadd.f32 %v298_v22, %v148_v23 }
 0x185   :  { %v157_v26 = vmax.f32 %v156_v25, 0.0 }
 0x187   :  { %315 = vmatmul.mubr.msk.f32.vlgmr.msra.gmra.mrb[0].mxu1 %vm159_vm4, %v157_v26 }
 0x25a   :  { %v233_v28 = vpop.f32.mrb[0].mxu1 }
 0x25b   :  { %v244_v30 = vmul.f32 %v301_v27, %v233_v28  ;;  %v316_v31 = vpop.f32.mrb[1].mxu1 }
 0x25d   :  { %v252_v32 = vadd.f32 %v302_v29, %v244_v30 }
 0x25f   :  { %v253_v33 = vadd.f32 3.0, %v252_v32 }
 0x261   :  { %v254_v34 = vmax.f32 %v253_v33, 0.0 }
 0x263   :  { %v255_v35 = vmin.f32 %v254_v34, 6.0 }
 0x265   :  { %v256_v37 = vmul.f32 0.16666667, %v255_v35 }
 0x267   :  { %v260_v38 = vrot.slane %v256_v37, %v259_v36  ;;  %v267_v40 = vrot.slane %v256_v37, %v266_v39 }
 0x269   :  { %262 = vbcast.lane.b32.xlu1 %v260_v38, 256 }
 0x26d   :  { %269 = vbcast.lane.b32.xlu1 %v267_v40, 256 }
 0x2db   :  { %v263_v41 = vpop.permute.xlu1 %262 }
 0x2dc   :  { %v271_v42 = vmul.f32 %v263_v41, %v41_v0  ;;  %v272_v43 = vmul.f32 %v263_v41, %v42_v1 }
 0x2de   :  { %275 = vst [vmem:[#allocation5] sm:$0xff] %v271_v42  ;;  %276 = vst [vmem:[#allocation5 + $0x8] sm:$0xff] %v272_v43 }
 0x2df   :  { %v270_v44 = vpop.permute.xlu1 %269 }
 0x2e0   :  { %v273_v45 = vmul.f32 %v270_v44, %v432_v2  ;;  %v274_v46 = vmul.f32 %v270_v44, %v434_v4 }
 0x2e2   :  { %277 = vst [vmem:[#allocation5 + $0x10] sm:$0xff] %v273_v45  ;;  %278 = vst [vmem:[#allocation5 + $0x18] sm:$0xff] %v274_v46 }
 0x2e3   :  { %356 = shalt.err (!%p353_p12)
}
 0x2e4   :  { %s357_s25 = scalar_lea.hbm %s480_s7, 512 }
 0x2e5   :  { %p358_p13 = scmp.ne.s32.totalorder %s480_s7, %s357_s25  ;;  %p361_p0 = scmp.lt.u32.totalorder %s357_s25, %s480_s7 }
 0x2e7   :  { %p363_p1 = pnand %p361_p0, %p358_p13 }
 0x2e9   :  { %366 = shalt.err (!%p363_p1)
}
 0x2ea   :  { %290 = dma.vmem_to_hbm [thread:$0]  %s285_s3, 512, %s480_s7, [#allocation4], %s372_s11, %s372_s11, %s373_s12  }
 0x2eb   :  { %369 = dma.done.wait [#allocation4], 512  }
 0x2ec   :  { %370 = vsyncadd [#allocation4], 4294966784 }
 0x2ed   :  { %294 = vsyncpa [#allocation3], 1 }
 0x2ee   :  { %295 = vsyncpa [#allocation4], 1 }

</bundles_post_ra>
